<compile_context>
chip_gen: v7x
topology: tpu7x:2x2x1
jax: 0.10.0
libtpu: 0.0.40
codegen_flags: <defaults>
</compile_context>

<pallas_src>
import functools

import jax
import jax.numpy as jnp
from jax.experimental import pallas as pl
from jax.experimental.pallas import tpu as pltpu


OUT_PAD = 128  # lane-dense padded width for the 3-wide fc3 output (do NOT widen)


def predictor_fc_kernel(x_ref, w1_ref, b1_ref, w2_ref, b2_ref, w3_ref, b3_ref,
                        o_ref):
    # fc1 (+ folded bn1) + ReLU.  x arrives f32 from HBM; cast to bf16 in-kernel
    # so the wrapper never materializes a separate bf16 copy of x.
    xb = x_ref[...].astype(jnp.bfloat16)
    h = jnp.dot(xb, w1_ref[...], preferred_element_type=jnp.float32) + b1_ref[...]
    h = jnp.maximum(h, 0.0)
    # TODO(synk): dropout1 (p=0.2) is identity in eval mode; training RNG mask not emitted.

    # fc2 (+ folded bn2) + ReLU
    h = jnp.dot(h.astype(jnp.bfloat16), w2_ref[...],
                preferred_element_type=jnp.float32) + b2_ref[...]
    h = jnp.maximum(h, 0.0)
    # TODO(synk): dropout2 (p=0.2) is identity in eval mode.

    # fc3: lane-padded to 128 output columns (pad cols have zero weight/bias).
    # bf16 store halves output HBM writeback; wrapper slices the 3 real logits.
    o_ref[...] = (jnp.dot(h.astype(jnp.bfloat16), w3_ref[...],
                          preferred_element_type=jnp.float32)
                  + b3_ref[...]).astype(o_ref.dtype)


# ---------------------------------------------------------------------------
# Parameter construction / one-time preparation
# ---------------------------------------------------------------------------

def init_linear(key, in_f, out_f):
    """Deterministic PyTorch-style nn.Linear init (uniform +/- 1/sqrt(in_f))."""
    kw, kb = jax.random.split(key)
    bound = 1.0 / jnp.sqrt(jnp.float32(in_f))
    w = jax.random.uniform(kw, (out_f, in_f), jnp.float32, -bound, bound)
    b = jax.random.uniform(kb, (out_f,), jnp.float32, -bound, bound)
    return w, b


def make_params(n=1, add_box=False, seed=0):
    in_channel = 512 * n if add_box else 256 * n
    k = jax.random.PRNGKey(seed)
    k1, k2, k3 = jax.random.split(k, 3)
    w1, b1 = init_linear(k1, in_channel, 512)
    w2, b2 = init_linear(k2, 512, 512)
    w3, b3 = init_linear(k3, 512, 3)
    # BatchNorm1d defaults: gamma=1, beta=0, running_mean=0, running_var=1
    bn1 = dict(gamma=jnp.ones((512,), jnp.float32), beta=jnp.zeros((512,), jnp.float32),
               mean=jnp.zeros((512,), jnp.float32), var=jnp.ones((512,), jnp.float32))
    bn2 = dict(gamma=jnp.ones((512,), jnp.float32), beta=jnp.zeros((512,), jnp.float32),
               mean=jnp.zeros((512,), jnp.float32), var=jnp.ones((512,), jnp.float32))
    return dict(w1=w1, b1=b1, w2=w2, b2=b2, w3=w3, b3=b3, bn1=bn1, bn2=bn2,
                in_channel=in_channel)


def _fold_bn(bn, eps=1e-5):
    scale = bn["gamma"] / jnp.sqrt(bn["var"] + eps)
    shift = bn["beta"] - bn["mean"] * scale
    return scale, shift


def prepare_params(params):
    """ONE-TIME fold of BN into weights/biases, bf16 cast, fc3 lane padding.

    Call once and reuse the returned tuple on every forward call; this is
    deliberately *not* part of the (jit'd) per-call path.
    """
    s1, t1 = _fold_bn(params["bn1"])
    s2, t2 = _fold_bn(params["bn2"])

    # y = (x @ W^T + b) * s + t  ==  x @ (W^T * s) + (b*s + t)
    w1 = (params["w1"].T * s1[None, :]).astype(jnp.bfloat16)          # (in, 512)
    b1 = (params["b1"] * s1 + t1)[None, :].astype(jnp.float32)        # (1, 512)
    w2 = (params["w2"].T * s2[None, :]).astype(jnp.bfloat16)          # (512, 512)
    b2 = (params["b2"] * s2 + t2)[None, :].astype(jnp.float32)        # (1, 512)

    w3 = jnp.zeros((512, OUT_PAD), jnp.float32).at[:, :3].set(params["w3"].T)
    w3 = w3.astype(jnp.bfloat16)                                      # (512, 128)
    b3 = jnp.zeros((1, OUT_PAD), jnp.float32).at[:, :3].set(params["b3"][None, :])

    prep = (w1, b1, w2, b2, w3, b3)
    return tuple(jax.block_until_ready(p) for p in prep)   # materialize now


# ---------------------------------------------------------------------------
# Forward pass (jit'd; kernel + thin wrapper)
# ---------------------------------------------------------------------------

def _round_up(a, m):
    return ((a + m - 1) // m) * m


@functools.partial(jax.jit, static_argnames=("tb_max",))
def predictor_fc(x, prep, tb_max=1024):
    w1, b1, w2, b2, w3, b3 = prep
    B = x.shape[0]
    xf = x.reshape(B, -1).astype(jnp.float32)               # x.view(x.size(0), -1)
    in_channel = xf.shape[1]
    assert w1.shape[0] == in_channel

    # Batch tiling: rows are multiples of 8 (sublane).  Aim for >= 2 tiles so
    # dimension_semantics=("parallel",) can shard the grid across both v7x
    # TensorCores, while keeping remainder padding small (<= 8*ntiles rows).
    b8 = _round_up(B, 8)
    if b8 <= 8:
        tb = b8                                             # single tile; can't split
    else:
        ntiles = max(2, pl.cdiv(b8, tb_max))
        tb = _round_up(pl.cdiv(b8, ntiles), 8)
    ntiles = pl.cdiv(b8, tb)
    bp = ntiles * tb
    if bp != B:
        xf = jnp.pad(xf, ((0, bp - B), (0, 0)))

    flops = 2 * bp * (in_channel * 512 + 512 * 512 + 512 * OUT_PAD)
    bytes_accessed = (xf.size * 4
                      + w1.size * 2 + w2.size * 2 + w3.size * 2
                      + b1.size * 4 + b2.size * 4 + b3.size * 4
                      + bp * OUT_PAD * 2)

    out = pl.pallas_call(
        predictor_fc_kernel,
        out_shape=jax.ShapeDtypeStruct((bp, OUT_PAD), jnp.bfloat16),
        grid=(ntiles,),
        in_specs=[
            pl.BlockSpec((tb, in_channel), lambda i: (i, 0)),    # x tiles (pipelined)
            pl.BlockSpec((in_channel, 512), lambda i: (0, 0)),   # weights stay VMEM-resident
            pl.BlockSpec((1, 512), lambda i: (0, 0)),
            pl.BlockSpec((512, 512), lambda i: (0, 0)),
            pl.BlockSpec((1, 512), lambda i: (0, 0)),
            pl.BlockSpec((512, OUT_PAD), lambda i: (0, 0)),
            pl.BlockSpec((1, OUT_PAD), lambda i: (0, 0)),
        ],
        out_specs=pl.BlockSpec((tb, OUT_PAD), lambda i: (i, 0)),
        compiler_params=pltpu.CompilerParams(
            dimension_semantics=("parallel",),
            vmem_limit_bytes=32 * 1024 * 1024),
        cost_estimate=pl.CostEstimate(flops=flops, transcendentals=0,
                                      bytes_accessed=bytes_accessed),
    )(xf, w1, b1, w2, b2, w3, b3)

    # Drop batch padding and the 125 zero lane-pad columns; restore f32 output.
    return out[:B, :3].astype(jnp.float32)


# ---------------------------------------------------------------------------
# References
# ---------------------------------------------------------------------------

def reference_f32(x, params):
    """Pure f32 reference of the PyTorch module in eval mode."""
    B = x.shape[0]
    h = x.reshape(B, -1).astype(jnp.float32)
    s1, t1 = _fold_bn(params["bn1"])
    s2, t2 = _fold_bn(params["bn2"])
    h = h @ params["w1"].T + params["b1"]
    h = jnp.maximum(h * s1 + t1, 0.0)
    h = h @ params["w2"].T + params["b2"]
    h = jnp.maximum(h * s2 + t2, 0.0)
    return h @ params["w3"].T + params["b3"]


def reference_bf16(x, prep):
    """Reference mirroring the kernel's bf16 quantization (tight check)."""
    w1, b1, w2, b2, w3, b3 = prep
    B = x.shape[0]
    h = x.reshape(B, -1).astype(jnp.bfloat16).astype(jnp.float32)
    h = jnp.maximum(h @ w1.astype(jnp.float32) + b1, 0.0)
    h = h.astype(jnp.bfloat16).astype(jnp.float32)
    h = jnp.maximum(h @ w2.astype(jnp.float32) + b2, 0.0)
    h = h.astype(jnp.bfloat16).astype(jnp.float32)
    out = (h @ w3.astype(jnp.float32) + b3)[:, :3]
    return out.astype(jnp.bfloat16).astype(jnp.float32)   # mirror bf16 output store


if __name__ == "__main__":
    n, add_box = 1, False                 # in_channel = 256
    params = make_params(n=n, add_box=add_box, seed=0)
    prep = prepare_params(params)         # one-time weight prep, cached

    key = jax.random.PRNGKey(0)
    # 4-D input, flattened by x.view(x.size(0), -1): 4*8*8 = 256 = in_channel
    x = jax.random.normal(key, (8, 4, 8, 8), jnp.float32)

    out = jax.block_until_ready(predictor_fc(x, prep))
    assert out.shape == (8, 3)

    # Tight check vs. a reference with the same bf16 weight/activation/output quantization.
    ref_q = reference_bf16(x, prep)
    assert jnp.allclose(out, ref_q, atol=1e-2, rtol=1e-2)

    # Looser check vs. the exact f32 module semantics (bf16 weights => ~1% error).
    ref = reference_f32(x, params)
    assert jnp.allclose(out, ref, atol=3e-2, rtol=3e-2)

    # Exercise the multi-tile (grid >= 2, "parallel" batch axis) + remainder-pad path.
    x2 = jax.random.normal(jax.random.PRNGKey(1), (24, 4, 8, 8), jnp.float32)
    out2 = jax.block_until_ready(predictor_fc(x2, prep))
    assert out2.shape == (24, 3)
    assert jnp.allclose(out2, reference_bf16(x2, prep), atol=1e-2, rtol=1e-2)

    print("KERNEL_OK")
</pallas_src>

<mosaic_0001>
module attributes {stable_mosaic.version = 11 : i64} {
  func.func @predictor_fc_kernel(%arg0: i32, %arg1: memref<8x256xf32, #tpu.memory_space<vmem>>, %arg2: memref<256x512xbf16, #tpu.memory_space<vmem>>, %arg3: memref<1x512xf32, #tpu.memory_space<vmem>>, %arg4: memref<512x512xbf16, #tpu.memory_space<vmem>>, %arg5: memref<1x512xf32, #tpu.memory_space<vmem>>, %arg6: memref<512x128xbf16, #tpu.memory_space<vmem>>, %arg7: memref<1x128xf32, #tpu.memory_space<vmem>>, %arg8: memref<8x128xbf16, #tpu.memory_space<vmem>>) attributes {dimension_semantics = [#tpu.dimension_semantics<parallel>], iteration_bounds = array<i64: 1>, scalar_prefetch = 0 : i64, scratch_operands = 0 : i64, tpu.core_type = #tpu.core_type<tc>, window_params = [{transform_indices = @transform_0, window_bounds = array<i64: 8, 256>}, {pipeline_mode = #tpu.pipeline_mode<synchronous>, transform_indices = @transform_1, window_bounds = array<i64: 256, 512>}, {pipeline_mode = #tpu.pipeline_mode<synchronous>, transform_indices = @transform_2, window_bounds = array<i64: 1, 512>}, {pipeline_mode = #tpu.pipeline_mode<synchronous>, transform_indices = @transform_3, window_bounds = array<i64: 512, 512>}, {pipeline_mode = #tpu.pipeline_mode<synchronous>, transform_indices = @transform_4, window_bounds = array<i64: 1, 512>}, {pipeline_mode = #tpu.pipeline_mode<synchronous>, transform_indices = @transform_5, window_bounds = array<i64: 512, 128>}, {pipeline_mode = #tpu.pipeline_mode<synchronous>, transform_indices = @transform_6, window_bounds = array<i64: 1, 128>}, {transform_indices = @transform_7, window_bounds = array<i64: 8, 128>}]} {
    %c0 = arith.constant 0 : index
    %c0_0 = arith.constant 0 : index
    %0 = vector.load %arg1[%c0, %c0_0] : memref<8x256xf32, #tpu.memory_space<vmem>>, vector<8x256xf32>
    %1 = arith.truncf %0 : vector<8x256xf32> to vector<8x256xbf16>
    %c0_1 = arith.constant 0 : index
    %c0_2 = arith.constant 0 : index
    %2 = vector.load %arg2[%c0_1, %c0_2] : memref<256x512xbf16, #tpu.memory_space<vmem>>, vector<256x512xbf16>
    %cst = arith.constant dense<0.000000e+00> : vector<8x512xf32>
    %3 = tpu.matmul %1, %2, %cst {dimension_numbers = #tpu.dot_dimension_numbers<[1], [0], [0], [1], [0, 0, 1, 1], [], []>} : vector<8x256xbf16>, vector<256x512xbf16>, vector<8x512xf32> -> vector<8x512xf32>
    %c0_3 = arith.constant 0 : index
    %c0_4 = arith.constant 0 : index
    %4 = vector.load %arg3[%c0_3, %c0_4] : memref<1x512xf32, #tpu.memory_space<vmem>>, vector<1x512xf32>
    %5 = vector.broadcast %4 : vector<1x512xf32> to vector<8x512xf32>
    %6 = arith.addf %3, %5 : vector<8x512xf32>
    %cst_5 = arith.constant 0.000000e+00 : f32
    %7 = vector.broadcast %cst_5 : f32 to vector<8x512xf32>
    %8 = arith.maximumf %6, %7 : vector<8x512xf32>
    %9 = arith.truncf %8 : vector<8x512xf32> to vector<8x512xbf16>
    %c0_6 = arith.constant 0 : index
    %c0_7 = arith.constant 0 : index
    %10 = vector.load %arg4[%c0_6, %c0_7] : memref<512x512xbf16, #tpu.memory_space<vmem>>, vector<512x512xbf16>
    %cst_8 = arith.constant dense<0.000000e+00> : vector<8x512xf32>
    %11 = tpu.matmul %9, %10, %cst_8 {dimension_numbers = #tpu.dot_dimension_numbers<[1], [0], [0], [1], [0, 0, 1, 1], [], []>} : vector<8x512xbf16>, vector<512x512xbf16>, vector<8x512xf32> -> vector<8x512xf32>
    %c0_9 = arith.constant 0 : index
    %c0_10 = arith.constant 0 : index
    %12 = vector.load %arg5[%c0_9, %c0_10] : memref<1x512xf32, #tpu.memory_space<vmem>>, vector<1x512xf32>
    %13 = vector.broadcast %12 : vector<1x512xf32> to vector<8x512xf32>
    %14 = arith.addf %11, %13 : vector<8x512xf32>
    %cst_11 = arith.constant 0.000000e+00 : f32
    %15 = vector.broadcast %cst_11 : f32 to vector<8x512xf32>
    %16 = arith.maximumf %14, %15 : vector<8x512xf32>
    %17 = arith.truncf %16 : vector<8x512xf32> to vector<8x512xbf16>
    %c0_12 = arith.constant 0 : index
    %c0_13 = arith.constant 0 : index
    %18 = vector.load %arg6[%c0_12, %c0_13] : memref<512x128xbf16, #tpu.memory_space<vmem>>, vector<512x128xbf16>
    %cst_14 = arith.constant dense<0.000000e+00> : vector<8x128xf32>
    %19 = tpu.matmul %17, %18, %cst_14 {dimension_numbers = #tpu.dot_dimension_numbers<[1], [0], [0], [1], [0, 0, 1, 1], [], []>} : vector<8x512xbf16>, vector<512x128xbf16>, vector<8x128xf32> -> vector<8x128xf32>
    %c0_15 = arith.constant 0 : index
    %c0_16 = arith.constant 0 : index
    %20 = vector.load %arg7[%c0_15, %c0_16] : memref<1x128xf32, #tpu.memory_space<vmem>>, vector<1x128xf32>
    %21 = vector.broadcast %20 : vector<1x128xf32> to vector<8x128xf32>
    %22 = arith.addf %19, %21 : vector<8x128xf32>
    %23 = arith.truncf %22 : vector<8x128xf32> to vector<8x128xbf16>
    %c0_17 = arith.constant 0 : index
    %c0_18 = arith.constant 0 : index
    %24 = vector.load %arg8[%c0_17, %c0_18] : memref<8x128xbf16, #tpu.memory_space<vmem>>, vector<8x128xbf16>
    tpu.vector_store %arg8[%c0_17, %c0_18], %23 {strides = array<i32>} : memref<8x128xbf16, #tpu.memory_space<vmem>>, vector<8x128xbf16>,
    return
  }
  func.func @transform_0(%arg0: i32) -> (i32, i32) {
    %c0_i32 = arith.constant 0 : i32
    %c0_i32_0 = arith.constant 0 : i32
    return %arg0, %c0_i32 : i32, i32
  }
  func.func @transform_1(%arg0: i32) -> (i32, i32) {
    %c0_i32 = arith.constant 0 : i32
    %c0_i32_0 = arith.constant 0 : i32
    %c0_i32_1 = arith.constant 0 : i32
    return %c0_i32, %c0_i32_0 : i32, i32
  }
  func.func @transform_2(%arg0: i32) -> (i32, i32) {
    %c0_i32 = arith.constant 0 : i32
    %c0_i32_0 = arith.constant 0 : i32
    %c0_i32_1 = arith.constant 0 : i32
    return %c0_i32, %c0_i32_0 : i32, i32
  }
  func.func @transform_3(%arg0: i32) -> (i32, i32) {
    %c0_i32 = arith.constant 0 : i32
    %c0_i32_0 = arith.constant 0 : i32
    %c0_i32_1 = arith.constant 0 : i32
    return %c0_i32, %c0_i32_0 : i32, i32
  }
  func.func @transform_4(%arg0: i32) -> (i32, i32) {
    %c0_i32 = arith.constant 0 : i32
    %c0_i32_0 = arith.constant 0 : i32
    %c0_i32_1 = arith.constant 0 : i32
    return %c0_i32, %c0_i32_0 : i32, i32
  }
  func.func @transform_5(%arg0: i32) -> (i32, i32) {
    %c0_i32 = arith.constant 0 : i32
    %c0_i32_0 = arith.constant 0 : i32
    %c0_i32_1 = arith.constant 0 : i32
    return %c0_i32, %c0_i32_0 : i32, i32
  }
  func.func @transform_6(%arg0: i32) -> (i32, i32) {
    %c0_i32 = arith.constant 0 : i32
    %c0_i32_0 = arith.constant 0 : i32
    %c0_i32_1 = arith.constant 0 : i32
    return %c0_i32, %c0_i32_0 : i32, i32
  }
  func.func @transform_7(%arg0: i32) -> (i32, i32) {
    %c0_i32 = arith.constant 0 : i32
    %c0_i32_0 = arith.constant 0 : i32
    return %arg0, %c0_i32 : i32, i32
  }
}

</mosaic_0001>

<bundles_post_ra>
// kernel: predictor_fc.1
= control target key start
LH: loop header
LB: loop body
LE: loop exit
PB: predicated region body
PF: predicated region fallthrough
CT: control target
= control target key end

     0   :  { %12 = vsyncpa [#allocation3], 0  ;;  %s2734_s0 = inlined_call_operand.vmem [shape: f32[8,256], index: 0, kind: input, shape index: {}]   ;;  %s2735_s1 = inlined_call_operand.hbm [shape: bf16[256,512], index: 1, kind: input, shape index: {}]   ;;  %s2736_s2 = inlined_call_operand.vmem [shape: f32[1,512], index: 2, kind: input, shape index: {}]   ;;  %s2737_s3 = inlined_call_operand.hbm [shape: bf16[512,512], index: 3, kind: input, shape index: {}]   ;;  %s2738_s4 = inlined_call_operand.vmem [shape: f32[1,512], index: 4, kind: input, shape index: {}]   ;;  %s2739_s5 = inlined_call_operand.vmem [shape: bf16[512,128], index: 5, kind: input, shape index: {}]   ;;  %s2740_s6 = inlined_call_operand.vmem [shape: f32[1,128], index: 6, kind: input, shape index: {}]   ;;  %s2741_s7 = inlined_call_operand.vmem [shape: bf16[8,128], index: 7, kind: output, shape index: {}]  }
   0x1   :  { %13 = vsyncpa [#allocation5], 0  ;;  %s2521_s24 = smov [#allocation2]   ;;  %s2473_s28 = scalar_lea.hbm %s2735_s1, 8192 }
   0x2   :  { %s21_s25 = sshll.u32 %s2521_s24, 4  ;;  %p2474_p0 = scmp.ne.s32.totalorder %s2735_s1, %s2473_s28  ;;  %s22_s25 = int_to_ptr.vmem [resolvable:$true] %s21_s25 }
   0x3   :  { %p2477_p1 = scmp.lt.u32.totalorder %s2473_s28, %s2735_s1 }
   0x5   :  { %p2479_p2 = pnand %p2477_p1, %p2474_p0 }
   0x7   :  { %2482 = shalt.err (!%p2479_p2)
}
   0x8   :  { %s2483_s10 = scalar_lea.vmem %s22_s25, 8192  ;;  %p2488_p4 = scmp.lt.s32.totalorder %s22_s25, %s22_s25 }
   0x9   :  { %p2484_p3 = scmp.ne.s32.totalorder %s22_s25, %s2483_s10  ;;  %p2489_p5 = scmp.lt.s32.totalorder %s2483_s10, %s2483_s10 }
   0xb   :  { %p2490_p6 = por %p2489_p5, %p2488_p4 }
   0xd   :  { %p2491_p7 = pnand %p2490_p6, %p2484_p3 }
   0xf   :  { %2494 = shalt.err (!%p2491_p7)
}
  0x10   :  { %s2522_s11 = smov 256   ;;  %s2523_s12 = smov 16  }
  0x11   :  { %27 = dma.hbm_to_vmem [thread:$0]  %s2735_s1, 8192, %s22_s25, [#allocation3], %s2522_s11, %s2522_s11, %s2523_s12  }
  0x12   :  { %s2524_s15 = smov [#allocation4]   ;;  %s2495_s19 = scalar_lea.hbm %s2737_s3, 16384 }
  0x13   :  { %s35_s16 = sshll.u32 %s2524_s15, 4  ;;  %p2496_p8 = scmp.ne.s32.totalorder %s2737_s3, %s2495_s19  ;;  %s36_s16 = int_to_ptr.vmem [resolvable:$true] %s35_s16 }
  0x14   :  { %p2499_p9 = scmp.lt.u32.totalorder %s2495_s19, %s2737_s3 }
  0x16   :  { %p2501_p10 = pnand %p2499_p9, %p2496_p8 }
  0x18   :  { %2504 = shalt.err (!%p2501_p10)
}
  0x19   :  { %s2505_s24 = scalar_lea.vmem %s36_s16, 16384  ;;  %p2510_p12 = scmp.lt.s32.totalorder %s36_s16, %s36_s16 }
  0x1a   :  { %p2506_p11 = scmp.ne.s32.totalorder %s36_s16, %s2505_s24  ;;  %p2511_p13 = scmp.lt.s32.totalorder %s2505_s24, %s2505_s24 }
  0x1c   :  { %p2512_p0 = por %p2511_p13, %p2510_p12 }
  0x1e   :  { %p2513_p1 = pnand %p2512_p0, %p2506_p11 }
  0x20   :  { %2516 = shalt.err (!%p2513_p1)
}
  0x21   :  { %41 = dma.hbm_to_vmem [thread:$0]  %s2737_s3, 16384, %s36_s16, [#allocation5], %s2522_s11, %s2522_s11, %s2523_s12  }
  0x22   :  { %2517 = dma.done.wait [#allocation3], 8192  }
  0x23   :  { %2518 = vsyncadd [#allocation3], 4294959104 }
  0x24   :  { %2519 = dma.done.wait [#allocation5], 16384  }
  0x25   :  { %2520 = vsyncadd [#allocation5], 4294950912  ;;  %v2153_v0 = vld [vmem:[#allocation2 + $0x4] ss:$16 sps:$4 sm:$0xff]   ;;  %v2155_v1 = vld [vmem:[#allocation2] ss:$16 sps:$4 sm:$0xff]  }
  0x26   :  { %465 = vmatprep.subr.bf16.mxu0 %v2153_v0  ;;  %v2156_v2 = vld [vmem:[#allocation2 + $0x24] ss:$16 sps:$4 sm:$0xff]   ;;  %v2158_v3 = vld [vmem:[#allocation2 + $0x20] ss:$16 sps:$4 sm:$0xff]   ;;  %v2200_v13 = vld [vmem:[#allocation2 + $0xc] ss:$16 sps:$4 sm:$0xff]  }
  0x27   :  { %466 = vmatpush1.bf16.msra.mxu0 %v2155_v1  ;;  %v2159_v4 = vld [vmem:[#allocation2 + $0x44] ss:$16 sps:$4 sm:$0xff]   ;;  %v2161_v5 = vld [vmem:[#allocation2 + $0x40] ss:$16 sps:$4 sm:$0xff]   ;;  %v2203_v15 = vld [vmem:[#allocation2 + $0x8] ss:$16 sps:$4 sm:$0xff]   ;;  %506 = vmatprep.subr.bf16.mxu1 %v2200_v13 }
  0x28   :  { %467 = vmatprep.subr.bf16.mxu0 %v2156_v2  ;;  %v2162_v6 = vld [vmem:[#allocation2 + $0x64] ss:$16 sps:$4 sm:$0xff]   ;;  %v2164_v7 = vld [vmem:[#allocation2 + $0x60] ss:$16 sps:$4 sm:$0xff]   ;;  %v56_v16 = vld [vmem:[%s2734_s0 + $0x8] sm:$0xff]  ;;  %507 = vmatpush1.bf16.msra.mxu1 %v2203_v15 }
  0x29   :  { %v2165_v8 = vld [vmem:[#allocation2 + $0x84] ss:$16 sps:$4 sm:$0xff]   ;;  %v2167_v9 = vld [vmem:[#allocation2 + $0x80] ss:$16 sps:$4 sm:$0xff]   ;;  %v58_v18 = vpack.c.bf16 %v56_v16, %v56_v16  ;;  %v2204_v19 = vld [vmem:[#allocation2 + $0x2c] ss:$16 sps:$4 sm:$0xff]  }
  0x2a   :  { %v2168_v10 = vld [vmem:[#allocation2 + $0xa4] ss:$16 sps:$4 sm:$0xff]   ;;  %v2170_v11 = vld [vmem:[#allocation2 + $0xa0] ss:$16 sps:$4 sm:$0xff]   ;;  %v2206_v20 = vld [vmem:[#allocation2 + $0x28] ss:$16 sps:$4 sm:$0xff]   ;;  %508 = vmatprep.subr.bf16.mxu1 %v2204_v19 }
  0x2b   :  { %468 = vmatpush1.bf16.msra.mxu0 %v2158_v3  ;;  %v2171_v12 = vld [vmem:[#allocation2 + $0xc4] ss:$16 sps:$4 sm:$0xff]   ;;  %v2173_v14 = vld [vmem:[#allocation2 + $0xc0] ss:$16 sps:$4 sm:$0xff]   ;;  %497 = vmatprep.mubr.bf16.mxu0 %v58_v18  ;;  %v2207_v21 = vld [vmem:[#allocation2 + $0x4c] ss:$16 sps:$4 sm:$0xff]  }
  0x2c   :  { %469 = vmatprep.subr.bf16.mxu0 %v2159_v4  ;;  %v2174_v17 = vld [vmem:[#allocation2 + $0xe4] ss:$16 sps:$4 sm:$0xff]   ;;  %538 = vmatprep.mubr.bf16.mxu1 %v58_v18  ;;  %v2176_v22 = vld [vmem:[#allocation2 + $0xe0] ss:$16 sps:$4 sm:$0xff]   ;;  %v2209_v24 = vld [vmem:[#allocation2 + $0x48] ss:$16 sps:$4 sm:$0xff]  }
  0x2d   :  { %v2177_v23 = vld [vmem:[#allocation2 + $0x104] ss:$16 sps:$4 sm:$0xff]   ;;  %509 = vmatpush1.bf16.msra.mxu1 %v2206_v20  ;;  %v2210_v25 = vld [vmem:[#allocation2 + $0x6c] ss:$16 sps:$4 sm:$0xff]   ;;  %v2179_v26 = vld [vmem:[#allocation2 + $0x100] ss:$16 sps:$4 sm:$0xff]  }
  0x2e   :  { %510 = vmatprep.subr.bf16.mxu1 %v2207_v21  ;;  %v2180_v27 = vld [vmem:[#allocation2 + $0x124] ss:$16 sps:$4 sm:$0xff]   ;;  %v2212_v28 = vld [vmem:[#allocation2 + $0x68] ss:$16 sps:$4 sm:$0xff]   ;;  %v2213_v29 = vld [vmem:[#allocation2 + $0x8c] ss:$16 sps:$4 sm:$0xff]  }
  0x2f   :  { %470 = vmatpush1.bf16.msra.mxu0 %v2161_v5  ;;  %v2182_v30 = vld [vmem:[#allocation2 + $0x120] ss:$16 sps:$4 sm:$0xff]   ;;  %v2183_v31 = vld [vmem:[#allocation2 + $0x144] ss:$16 sps:$4 sm:$0xff]   ;;  %v2215_v32 = vld [vmem:[#allocation2 + $0x88] ss:$16 sps:$4 sm:$0xff]  }
  0x30   :  { %471 = vmatprep.subr.bf16.mxu0 %v2162_v6  ;;  %v2216_v33 = vld [vmem:[#allocation2 + $0xac] ss:$16 sps:$4 sm:$0xff]   ;;  %v2185_v34 = vld [vmem:[#allocation2 + $0x140] ss:$16 sps:$4 sm:$0xff]   ;;  %v2186_v35 = vld [vmem:[#allocation2 + $0x164] ss:$16 sps:$4 sm:$0xff]  }
  0x31   :  { %511 = vmatpush1.bf16.msra.mxu1 %v2209_v24  ;;  %v2218_v36 = vld [vmem:[#allocation2 + $0xa8] ss:$16 sps:$4 sm:$0xff]   ;;  %v2219_v37 = vld [vmem:[#allocation2 + $0xcc] ss:$16 sps:$4 sm:$0xff]   ;;  %v2188_v38 = vld [vmem:[#allocation2 + $0x160] ss:$16 sps:$4 sm:$0xff]  }
  0x32   :  { %512 = vmatprep.subr.bf16.mxu1 %v2210_v25  ;;  %v2189_v39 = vld [vmem:[#allocation2 + $0x184] ss:$16 sps:$4 sm:$0xff]   ;;  %v2221_v40 = vld [vmem:[#allocation2 + $0xc8] ss:$16 sps:$4 sm:$0xff]   ;;  %v2222_v41 = vld [vmem:[#allocation2 + $0xec] ss:$16 sps:$4 sm:$0xff]  }
  0x33   :  { %472 = vmatpush1.bf16.msra.mxu0 %v2164_v7  ;;  %v2191_v42 = vld [vmem:[#allocation2 + $0x180] ss:$16 sps:$4 sm:$0xff]   ;;  %v2192_v43 = vld [vmem:[#allocation2 + $0x1a4] ss:$16 sps:$4 sm:$0xff]   ;;  %v2224_v44 = vld [vmem:[#allocation2 + $0xe8] ss:$16 sps:$4 sm:$0xff]  }
  0x34   :  { %473 = vmatprep.subr.bf16.mxu0 %v2165_v8  ;;  %v2225_v45 = vld [vmem:[#allocation2 + $0x10c] ss:$16 sps:$4 sm:$0xff]   ;;  %v2194_v46 = vld [vmem:[#allocation2 + $0x1a0] ss:$16 sps:$4 sm:$0xff]   ;;  %v2195_v47 = vld [vmem:[#allocation2 + $0x1c4] ss:$16 sps:$4 sm:$0xff]  }
  0x35   :  { %513 = vmatpush1.bf16.msra.mxu1 %v2212_v28  ;;  %v2227_v48 = vld [vmem:[#allocation2 + $0x108] ss:$16 sps:$4 sm:$0xff]   ;;  %v2228_v49 = vld [vmem:[#allocation2 + $0x12c] ss:$16 sps:$4 sm:$0xff]   ;;  %v2197_v50 = vld [vmem:[#allocation2 + $0x1c0] ss:$16 sps:$4 sm:$0xff]  }
  0x36   :  { %514 = vmatprep.subr.bf16.mxu1 %v2213_v29  ;;  %v2198_v51 = vld [vmem:[#allocation2 + $0x1e4] ss:$16 sps:$4 sm:$0xff]   ;;  %v2230_v52 = vld [vmem:[#allocation2 + $0x128] ss:$16 sps:$4 sm:$0xff]   ;;  %v2231_v53 = vld [vmem:[#allocation2 + $0x14c] ss:$16 sps:$4 sm:$0xff]  }
  0x37   :  { %474 = vmatpush1.bf16.msra.mxu0 %v2167_v9  ;;  %v2202_v54 = vld [vmem:[#allocation2 + $0x1e0] ss:$16 sps:$4 sm:$0xff]   ;;  %v2233_v56 = vld [vmem:[#allocation2 + $0x148] ss:$16 sps:$4 sm:$0xff]   ;;  %v2251_v57 = vld [vmem:[#allocation4 + $0x4] ss:$16 sps:$4 sm:$0xff]  }
  0x38   :  { %475 = vmatprep.subr.bf16.mxu0 %v2168_v10  ;;  %v55_v55 = vld [vmem:[%s2734_s0] sm:$0xff]  ;;  %v2234_v58 = vld [vmem:[#allocation2 + $0x16c] ss:$16 sps:$4 sm:$0xff]   ;;  %v2236_v61 = vld [vmem:[#allocation2 + $0x168] ss:$16 sps:$4 sm:$0xff]  }
  0x39   :  { %515 = vmatpush1.bf16.msra.mxu1 %v2215_v32  ;;  %v57_v59 = vpack.c.bf16 %v55_v55, %v55_v55  ;;  %v2249_v60 = vld [vmem:[#allocation4] ss:$16 sps:$4 sm:$0xff]   ;;  %v2257_v62 = vld [vmem:[#allocation4 + $0x24] ss:$16 sps:$4 sm:$0xff]   ;;  %v2237_v63 = vld [vmem:[#allocation2 + $0x18c] ss:$16 sps:$4 sm:$0xff]  }
  0x3a   :  { %516 = vmatprep.subr.bf16.mxu1 %v2216_v33  ;;  %v2255_v0 = vld [vmem:[#allocation4 + $0x20] ss:$16 sps:$4 sm:$0xff]   ;;  %v2239_v1 = vld [vmem:[#allocation2 + $0x188] ss:$16 sps:$4 sm:$0xff]   ;;  %v2263_v2 = vld [vmem:[#allocation4 + $0x44] ss:$16 sps:$4 sm:$0xff]  }
  0x3b   :  { %476 = vmatpush1.bf16.msra.mxu0 %v2170_v11  ;;  %v2240_v3 = vld [vmem:[#allocation2 + $0x1ac] ss:$16 sps:$4 sm:$0xff]   ;;  %v2261_v4 = vld [vmem:[#allocation4 + $0x40] ss:$16 sps:$4 sm:$0xff]   ;;  %v2242_v5 = vld [vmem:[#allocation2 + $0x1a8] ss:$16 sps:$4 sm:$0xff]  }
  0x3c   :  { %477 = vmatprep.subr.bf16.mxu0 %v2171_v12  ;;  %v2269_v6 = vld [vmem:[#allocation4 + $0x64] ss:$16 sps:$4 sm:$0xff]   ;;  %v2243_v7 = vld [vmem:[#allocation2 + $0x1cc] ss:$16 sps:$4 sm:$0xff]   ;;  %v2267_v8 = vld [vmem:[#allocation4 + $0x60] ss:$16 sps:$4 sm:$0xff]  }
  0x3d   :  { %517 = vmatpush1.bf16.msra.mxu1 %v2218_v36  ;;  %v2245_v9 = vld [vmem:[#allocation2 + $0x1c8] ss:$16 sps:$4 sm:$0xff]   ;;  %v2275_v10 = vld [vmem:[#allocation4 + $0x84] ss:$16 sps:$4 sm:$0xff]   ;;  %v2246_v11 = vld [vmem:[#allocation2 + $0x1ec] ss:$16 sps:$4 sm:$0xff]  }
  0x3e   :  { %518 = vmatprep.subr.bf16.mxu1 %v2219_v37  ;;  %v2273_v12 = vld [vmem:[#allocation4 + $0x80] ss:$16 sps:$4 sm:$0xff]   ;;  %v2248_v13 = vld [vmem:[#allocation2 + $0x1e8] ss:$16 sps:$4 sm:$0xff]   ;;  %v2281_v15 = vld [vmem:[#allocation4 + $0xa4] ss:$16 sps:$4 sm:$0xff]  }
  0x3f   :  { %478 = vmatpush1.bf16.msra.mxu0 %v2173_v14  ;;  %v2254_v14 = vld [vmem:[#allocation4 + $0xc] ss:$16 sps:$4 sm:$0xff]   ;;  %v2279_v16 = vld [vmem:[#allocation4 + $0xa0] ss:$16 sps:$4 sm:$0xff]   ;;  %v2287_v18 = vld [vmem:[#allocation4 + $0xc4] ss:$16 sps:$4 sm:$0xff]  }
  0x40   :  { %479 = vmatprep.subr.bf16.mxu0 %v2174_v17  ;;  %v2252_v17 = vld [vmem:[#allocation4 + $0x8] ss:$16 sps:$4 sm:$0xff]   ;;  %v2260_v19 = vld [vmem:[#allocation4 + $0x2c] ss:$16 sps:$4 sm:$0xff]   ;;  %v2285_v20 = vld [vmem:[#allocation4 + $0xc0] ss:$16 sps:$4 sm:$0xff]  }
  0x41   :  { %519 = vmatpush1.bf16.msra.mxu1 %v2221_v40  ;;  %v2258_v21 = vld [vmem:[#allocation4 + $0x28] ss:$16 sps:$4 sm:$0xff]   ;;  %v2291_v24 = vld [vmem:[#allocation4 + $0xe0] ss:$16 sps:$4 sm:$0xff]  }
  0x42   :  { %520 = vmatprep.subr.bf16.mxu1 %v2222_v41  ;;  %v2264_v25 = vld [vmem:[#allocation4 + $0x48] ss:$16 sps:$4 sm:$0xff]   ;;  %v2297_v28 = vld [vmem:[#allocation4 + $0x100] ss:$16 sps:$4 sm:$0xff]  }
  0x43   :  { %480 = vmatpush1.bf16.msra.mxu0 %v2176_v22  ;;  %v2293_v22 = vld [vmem:[#allocation4 + $0xe4] ss:$16 sps:$4 sm:$0xff]   ;;  %v2270_v29 = vld [vmem:[#allocation4 + $0x68] ss:$16 sps:$4 sm:$0xff]   ;;  %v2303_v32 = vld [vmem:[#allocation4 + $0x120] ss:$16 sps:$4 sm:$0xff]  }
  0x44   :  { %481 = vmatprep.subr.bf16.mxu0 %v2177_v23  ;;  %v2266_v23 = vld [vmem:[#allocation4 + $0x4c] ss:$16 sps:$4 sm:$0xff]   ;;  %v2276_v33 = vld [vmem:[#allocation4 + $0x88] ss:$16 sps:$4 sm:$0xff]   ;;  %v2309_v36 = vld [vmem:[#allocation4 + $0x140] ss:$16 sps:$4 sm:$0xff]  }
  0x45   :  { %521 = vmatpush1.bf16.msra.mxu1 %v2224_v44  ;;  %v2282_v37 = vld [vmem:[#allocation4 + $0xa8] ss:$16 sps:$4 sm:$0xff]   ;;  %v2315_v40 = vld [vmem:[#allocation4 + $0x160] ss:$16 sps:$4 sm:$0xff]  }
  0x46   :  { %522 = vmatprep.subr.bf16.mxu1 %v2225_v45  ;;  %v2288_v41 = vld [vmem:[#allocation4 + $0xc8] ss:$16 sps:$4 sm:$0xff]   ;;  %v2321_v44 = vld [vmem:[#allocation4 + $0x180] ss:$16 sps:$4 sm:$0xff]  }
  0x47   :  { %482 = vmatpush1.bf16.msra.mxu0 %v2179_v26  ;;  %v2299_v26 = vld [vmem:[#allocation4 + $0x104] ss:$16 sps:$4 sm:$0xff]   ;;  %v2294_v45 = vld [vmem:[#allocation4 + $0xe8] ss:$16 sps:$4 sm:$0xff]  }
  0x48   :  { %483 = vmatprep.subr.bf16.mxu0 %v2180_v27  ;;  %v2272_v27 = vld [vmem:[#allocation4 + $0x6c] ss:$16 sps:$4 sm:$0xff]   ;;  %v2318_v55 = vld [vmem:[#allocation4 + $0x168] ss:$16 sps:$4 sm:$0xff]  }
  0x49   :  { %523 = vmatpush1.bf16.msra.mxu1 %v2227_v48  ;;  %v2327_v48 = vld [vmem:[#allocation4 + $0x1a0] ss:$16 sps:$4 sm:$0xff]  }
  0x4a   :  { %524 = vmatprep.subr.bf16.mxu1 %v2228_v49  ;;  %v2300_v49 = vld [vmem:[#allocation4 + $0x108] ss:$16 sps:$4 sm:$0xff]  }
  0x4b   :  { %484 = vmatpush1.bf16.msra.mxu0 %v2182_v30  ;;  %v2305_v30 = vld [vmem:[#allocation4 + $0x124] ss:$16 sps:$4 sm:$0xff]  }
  0x4c   :  { %485 = vmatprep.subr.bf16.mxu0 %v2183_v31  ;;  %v2278_v31 = vld [vmem:[#allocation4 + $0x8c] ss:$16 sps:$4 sm:$0xff]  }
  0x4d   :  { %525 = vmatpush1.bf16.msra.mxu1 %v2230_v52  ;;  %v2314_v52 = vld [vmem:[#allocation4 + $0x14c] ss:$16 sps:$4 sm:$0xff]  }
  0x4e   :  { %526 = vmatprep.subr.bf16.mxu1 %v2231_v53  ;;  %v2312_v53 = vld [vmem:[#allocation4 + $0x148] ss:$16 sps:$4 sm:$0xff]  }
  0x4f   :  { %486 = vmatpush1.bf16.msra.mxu0 %v2185_v34  ;;  %v2311_v34 = vld [vmem:[#allocation4 + $0x144] ss:$16 sps:$4 sm:$0xff]  }
  0x50   :  { %487 = vmatprep.subr.bf16.mxu0 %v2186_v35  ;;  %v2284_v35 = vld [vmem:[#allocation4 + $0xac] ss:$16 sps:$4 sm:$0xff]  }
  0x51   :  { %527 = vmatpush1.bf16.msra.mxu1 %v2233_v56  ;;  %v2326_v56 = vld [vmem:[#allocation4 + $0x18c] ss:$16 sps:$4 sm:$0xff]  }
  0x52   :  { %528 = vmatprep.subr.bf16.mxu1 %v2234_v58  ;;  %v2332_v58 = vld [vmem:[#allocation4 + $0x1ac] ss:$16 sps:$4 sm:$0xff]  }
  0x53   :  { %488 = vmatpush1.bf16.msra.mxu0 %v2188_v38  ;;  %v2317_v38 = vld [vmem:[#allocation4 + $0x164] ss:$16 sps:$4 sm:$0xff]  }
  0x54   :  { %489 = vmatprep.subr.bf16.mxu0 %v2189_v39  ;;  %v2290_v39 = vld [vmem:[#allocation4 + $0xcc] ss:$16 sps:$4 sm:$0xff]  }
  0x55   :  { %529 = vmatpush1.bf16.msra.mxu1 %v2236_v61  ;;  %v2338_v61 = vld [vmem:[#allocation4 + $0x1cc] ss:$16 sps:$4 sm:$0xff]  }
  0x56   :  { %530 = vmatprep.subr.bf16.mxu1 %v2237_v63  ;;  %v2336_v63 = vld [vmem:[#allocation4 + $0x1c8] ss:$16 sps:$4 sm:$0xff]  }
  0x57   :  { %490 = vmatpush1.bf16.msra.mxu0 %v2191_v42  ;;  %v2323_v42 = vld [vmem:[#allocation4 + $0x184] ss:$16 sps:$4 sm:$0xff]  }
  0x58   :  { %491 = vmatprep.subr.bf16.mxu0 %v2192_v43  ;;  %v2296_v43 = vld [vmem:[#allocation4 + $0xec] ss:$16 sps:$4 sm:$0xff]  }
  0x59   :  { %531 = vmatpush1.bf16.msra.mxu1 %v2239_v1  ;;  %v2344_v1 = vld [vmem:[#allocation4 + $0x1ec] ss:$16 sps:$4 sm:$0xff]  }
  0x5a   :  { %532 = vmatprep.subr.bf16.mxu1 %v2240_v3  ;;  %v2342_v3 = vld [vmem:[#allocation4 + $0x1e8] ss:$16 sps:$4 sm:$0xff]  }
  0x5b   :  { %492 = vmatpush1.bf16.msra.mxu0 %v2194_v46  ;;  %v2329_v46 = vld [vmem:[#allocation4 + $0x1a4] ss:$16 sps:$4 sm:$0xff]  }
  0x5c   :  { %493 = vmatprep.subr.bf16.mxu0 %v2195_v47  ;;  %v2302_v47 = vld [vmem:[#allocation4 + $0x10c] ss:$16 sps:$4 sm:$0xff]  }
  0x5d   :  { %533 = vmatpush1.bf16.msra.mxu1 %v2242_v5  ;;  %v2350_v5 = vld [vmem:[#allocation4 + $0x20c] ss:$16 sps:$4 sm:$0xff]  }
  0x5e   :  { %534 = vmatprep.subr.bf16.mxu1 %v2243_v7 }
  0x5f   :  { %494 = vmatpush1.bf16.msra.mxu0 %v2197_v50  ;;  %v2308_v50 = vld [vmem:[#allocation4 + $0x12c] ss:$16 sps:$4 sm:$0xff]  }
  0x60   :  { %495 = vmatprep.subr.bf16.mxu0 %v2198_v51  ;;  %v2306_v51 = vld [vmem:[#allocation4 + $0x128] ss:$16 sps:$4 sm:$0xff]  }
  0x61   :  { %535 = vmatpush1.bf16.msra.mxu1 %v2245_v9  ;;  %v2601_v9 = vld [vmem:[%s2736_s2] sm:$0xf] }
  0x62   :  { %536 = vmatprep.subr.bf16.mxu1 %v2246_v11 }
  0x63   :  { %496 = vmatpush1.bf16.msra.mxu0 %v2202_v54  ;;  %v2320_v54 = vld [vmem:[#allocation4 + $0x16c] ss:$16 sps:$4 sm:$0xff]  }
  0x64   :  { %1345 = vmatprep.subr.bf16.mxu0 %v2251_v57  ;;  %v2324_v57 = vld [vmem:[#allocation4 + $0x188] ss:$16 sps:$4 sm:$0xff]  }
  0x65   :  { %537 = vmatpush1.bf16.msra.mxu1 %v2248_v13 }
  0x66   :  { %498 = vmatmul.mubr.bf16.vlgmr.msra.gmra.mrb[0].mxu0 %v57_v59  ;;  %1427 = vmatprep.subr.bf16.mxu1 %v2254_v14 }
  0x67   :  { %1346 = vmatpush1.bf16.msra.mxu0 %v2249_v60  ;;  %v2335_v60 = vld [vmem:[#allocation4 + $0x1c4] ss:$16 sps:$4 sm:$0xff]  }
  0x68   :  { %1347 = vmatprep.subr.bf16.mxu0 %v2257_v62  ;;  %539 = vmatmul.mubr.bf16.vlgmr.msra.gmra.mrb[0].mxu1 %v57_v59  ;;  %v2330_v59 = vld [vmem:[#allocation4 + $0x1a8] ss:$16 sps:$4 sm:$0xff]   ;;  %v2333_v62 = vld [vmem:[#allocation4 + $0x1c0] ss:$16 sps:$4 sm:$0xff]  }
  0x69   :  { %1428 = vmatpush1.bf16.msra.mxu1 %v2252_v17 }
  0x6a   :  { %1429 = vmatprep.subr.bf16.mxu1 %v2260_v19 }
  0x6b   :  { %1348 = vmatpush1.bf16.msra.mxu0 %v2255_v0  ;;  %v2341_v0 = vld [vmem:[#allocation4 + $0x1e4] ss:$16 sps:$4 sm:$0xff]  }
  0x6c   :  { %1349 = vmatprep.subr.bf16.mxu0 %v2263_v2  ;;  %v2339_v2 = vld [vmem:[#allocation4 + $0x1e0] ss:$16 sps:$4 sm:$0xff]  }
  0x6d   :  { %1430 = vmatpush1.bf16.msra.mxu1 %v2258_v21 }
  0x6e   :  { %1431 = vmatprep.subr.bf16.mxu1 %v2266_v23  ;;  %v2348_v23 = vld [vmem:[#allocation4 + $0x208] ss:$16 sps:$4 sm:$0xff]  }
  0x6f   :  { %1350 = vmatpush1.bf16.msra.mxu0 %v2261_v4  ;;  %v2347_v4 = vld [vmem:[#allocation4 + $0x204] ss:$16 sps:$4 sm:$0xff]  }
  0x70   :  { %1351 = vmatprep.subr.bf16.mxu0 %v2269_v6  ;;  %v125_v6 = vlaneseq }
  0x71   :  { %1432 = vmatpush1.bf16.msra.mxu1 %v2264_v25  ;;  %v2353_v25 = vld [vmem:[#allocation4 + $0x224] ss:$16 sps:$4 sm:$0xff]  }
  0x72   :  { %1433 = vmatprep.subr.bf16.mxu1 %v2272_v27  ;;  %v2595_v7 = vshrl.u32 %v125_v6, 7  ;;  %v2351_v27 = vld [vmem:[#allocation4 + $0x220] ss:$16 sps:$4 sm:$0xff]   ;;  %v2407_v6 = vld [vmem:[#allocation4 + $0x344] ss:$16 sps:$4 sm:$0xff]  }
  0x73   :  { %1352 = vmatpush1.bf16.msra.mxu0 %v2267_v8 }
  0x74   :  { %1353 = vmatprep.subr.bf16.mxu0 %v2275_v10  ;;  %v127_v8 = vsub.s32 0, %v2595_v7  ;;  %v131_v10 = vsub.s32 1, %v2595_v7 }
  0x75   :  { %1434 = vmatpush1.bf16.msra.mxu1 %v2270_v29  ;;  %v2359_v29 = vld [vmem:[#allocation4 + $0x244] ss:$16 sps:$4 sm:$0xff]  }
  0x76   :  { %1435 = vmatprep.subr.bf16.mxu1 %v2278_v31  ;;  %v128_v11 = vrot.slane %v2601_v9, %v127_v8  ;;  %v2357_v31 = vld [vmem:[#allocation4 + $0x240] ss:$16 sps:$4 sm:$0xff]  }
  0x77   :  { %1354 = vmatpush1.bf16.msra.mxu0 %v2273_v12  ;;  %v132_v12 = vrot.slane %v2601_v9, %v131_v10 }
  0x78   :  { %1355 = vmatprep.subr.bf16.mxu0 %v2281_v15 }
  0x79   :  { %1436 = vmatpush1.bf16.msra.mxu1 %v2276_v33  ;;  %v2365_v33 = vld [vmem:[#allocation4 + $0x264] ss:$16 sps:$4 sm:$0xff]  }
  0x7a   :  { %1437 = vmatprep.subr.bf16.mxu1 %v2284_v35  ;;  %v139_v35 = vsub.s32 3, %v2595_v7 }
  0x7b   :  { %1356 = vmatpush1.bf16.msra.mxu0 %v2279_v16 }
  0x7c   :  { %1357 = vmatprep.subr.bf16.mxu0 %v2287_v18 }
  0x7d   :  { %1438 = vmatpush1.bf16.msra.mxu1 %v2282_v37  ;;  %v2366_v37 = vld [vmem:[#allocation4 + $0x268] ss:$16 sps:$4 sm:$0xff]  }
  0x7e   :  { %1439 = vmatprep.subr.bf16.mxu1 %v2290_v39  ;;  %v2374_v39 = vld [vmem:[#allocation4 + $0x28c] ss:$16 sps:$4 sm:$0xff]  }
  0x7f   :  { %1358 = vmatpush1.bf16.msra.mxu0 %v2285_v20 }
  0x80   :  { %1359 = vmatprep.subr.bf16.mxu0 %v2293_v22  ;;  %v2345_v22 = vld [vmem:[#allocation4 + $0x200] ss:$16 sps:$4 sm:$0xff]  }
  0x81   :  { %1440 = vmatpush1.bf16.msra.mxu1 %v2288_v41 }
  0x82   :  { %1441 = vmatprep.subr.bf16.mxu1 %v2296_v43  ;;  %v2372_v43 = vld [vmem:[#allocation4 + $0x288] ss:$16 sps:$4 sm:$0xff]  }
  0x83   :  { %1360 = vmatpush1.bf16.msra.mxu0 %v2291_v24 }
  0x84   :  { %1361 = vmatprep.subr.bf16.mxu0 %v2299_v26  ;;  %v2356_v26 = vld [vmem:[#allocation4 + $0x22c] ss:$16 sps:$4 sm:$0xff]  }
  0x85   :  { %1442 = vmatpush1.bf16.msra.mxu1 %v2294_v45  ;;  %v2377_v45 = vld [vmem:[#allocation4 + $0x2a4] ss:$16 sps:$4 sm:$0xff]  }
  0x86   :  { %1443 = vmatprep.subr.bf16.mxu1 %v2302_v47 }
  0x87   :  { %1362 = vmatpush1.bf16.msra.mxu0 %v2297_v28  ;;  %v2354_v28 = vld [vmem:[#allocation4 + $0x228] ss:$16 sps:$4 sm:$0xff]  }
  0x88   :  { %1363 = vmatprep.subr.bf16.mxu0 %v2305_v30  ;;  %v2362_v30 = vld [vmem:[#allocation4 + $0x24c] ss:$16 sps:$4 sm:$0xff]  }
  0x89   :  { %1444 = vmatpush1.bf16.msra.mxu1 %v2300_v49 }
  0x8a   :  { %1445 = vmatprep.subr.bf16.mxu1 %v2308_v50 }
  0x8b   :  { %1364 = vmatpush1.bf16.msra.mxu0 %v2303_v32  ;;  %v2360_v32 = vld [vmem:[#allocation4 + $0x248] ss:$16 sps:$4 sm:$0xff]  }
  0x8c   :  { %1365 = vmatprep.subr.bf16.mxu0 %v2311_v34  ;;  %v2368_v34 = vld [vmem:[#allocation4 + $0x26c] ss:$16 sps:$4 sm:$0xff]  }
  0x8d   :  { %1446 = vmatpush1.bf16.msra.mxu1 %v2306_v51  ;;  %v2375_v51 = vld [vmem:[#allocation4 + $0x2a0] ss:$16 sps:$4 sm:$0xff]  }
  0x8e   :  { %1447 = vmatprep.subr.bf16.mxu1 %v2314_v52  ;;  %v2378_v52 = vld [vmem:[#allocation4 + $0x2a8] ss:$16 sps:$4 sm:$0xff]  }
  0x8f   :  { %1366 = vmatpush1.bf16.msra.mxu0 %v2309_v36  ;;  %v2363_v36 = vld [vmem:[#allocation4 + $0x260] ss:$16 sps:$4 sm:$0xff]  }
  0x90   :  { %1367 = vmatprep.subr.bf16.mxu0 %v2317_v38  ;;  %v2371_v38 = vld [vmem:[#allocation4 + $0x284] ss:$16 sps:$4 sm:$0xff]  }
  0x91   :  { %1448 = vmatpush1.bf16.msra.mxu1 %v2312_v53  ;;  %v2383_v53 = vld [vmem:[#allocation4 + $0x2c4] ss:$16 sps:$4 sm:$0xff]  }
  0x92   :  { %1449 = vmatprep.subr.bf16.mxu1 %v2320_v54  ;;  %v2386_v54 = vld [vmem:[#allocation4 + $0x2cc] ss:$16 sps:$4 sm:$0xff]  }
  0x93   :  { %1368 = vmatpush1.bf16.msra.mxu0 %v2315_v40  ;;  %v140_v40 = vrot.slane %v2601_v9, %v139_v35 }
  0x94   :  { %1369 = vmatprep.subr.bf16.mxu0 %v2323_v42  ;;  %v2369_v42 = vld [vmem:[#allocation4 + $0x280] ss:$16 sps:$4 sm:$0xff]  }
  0x95   :  { %1450 = vmatpush1.bf16.msra.mxu1 %v2318_v55 }
  0x96   :  { %1451 = vmatprep.subr.bf16.mxu1 %v2326_v56  ;;  %v2381_v56 = vld [vmem:[#allocation4 + $0x2c0] ss:$16 sps:$4 sm:$0xff]  }
  0x97   :  { %1370 = vmatpush1.bf16.msra.mxu0 %v2321_v44 }
  0x98   :  { %1371 = vmatprep.subr.bf16.mxu0 %v2329_v46  ;;  %v2380_v46 = vld [vmem:[#allocation4 + $0x2ac] ss:$16 sps:$4 sm:$0xff]  }
  0x99   :  { %1452 = vmatpush1.bf16.msra.mxu1 %v2324_v57  ;;  %v2384_v57 = vld [vmem:[#allocation4 + $0x2c8] ss:$16 sps:$4 sm:$0xff]  }
  0x9a   :  { %1453 = vmatprep.subr.bf16.mxu1 %v2332_v58  ;;  %v2389_v58 = vld [vmem:[#allocation4 + $0x2e4] ss:$16 sps:$4 sm:$0xff]  }
  0x9b   :  { %1372 = vmatpush1.bf16.msra.mxu0 %v2327_v48 }
  0x9c   :  { %1373 = vmatprep.subr.bf16.mxu0 %v2335_v60  ;;  %v2387_v60 = vld [vmem:[#allocation4 + $0x2e0] ss:$16 sps:$4 sm:$0xff]  }
  0x9d   :  { %1454 = vmatpush1.bf16.msra.mxu1 %v2330_v59  ;;  %v2392_v59 = vld [vmem:[#allocation4 + $0x2ec] ss:$16 sps:$4 sm:$0xff]  }
  0x9e   :  { %1455 = vmatprep.subr.bf16.mxu1 %v2338_v61  ;;  %v2390_v61 = vld [vmem:[#allocation4 + $0x2e8] ss:$16 sps:$4 sm:$0xff]  }
  0x9f   :  { %1374 = vmatpush1.bf16.msra.mxu0 %v2333_v62  ;;  %v2395_v62 = vld [vmem:[#allocation4 + $0x304] ss:$16 sps:$4 sm:$0xff]  }
  0xa0   :  { %1375 = vmatprep.subr.bf16.mxu0 %v2341_v0  ;;  %v2393_v0 = vld [vmem:[#allocation4 + $0x300] ss:$16 sps:$4 sm:$0xff]  }
  0xa1   :  { %1456 = vmatpush1.bf16.msra.mxu1 %v2336_v63  ;;  %v2398_v63 = vld [vmem:[#allocation4 + $0x30c] ss:$16 sps:$4 sm:$0xff]  }
  0xa2   :  { %1457 = vmatprep.subr.bf16.mxu1 %v2344_v1  ;;  %v2396_v1 = vld [vmem:[#allocation4 + $0x308] ss:$16 sps:$4 sm:$0xff]  }
  0xa3   :  { %1376 = vmatpush1.bf16.msra.mxu0 %v2339_v2  ;;  %v2401_v2 = vld [vmem:[#allocation4 + $0x324] ss:$16 sps:$4 sm:$0xff]  }
  0xa4   :  { %1386 = vmatprep.subr.bf16.mxu0 %v2347_v4  ;;  %v2399_v4 = vld [vmem:[#allocation4 + $0x320] ss:$16 sps:$4 sm:$0xff]  }
  0xa5   :  { %1458 = vmatpush1.bf16.msra.mxu1 %v2342_v3  ;;  %v2404_v3 = vld [vmem:[#allocation4 + $0x32c] ss:$16 sps:$4 sm:$0xff]  }
  0xa6   :  { %1468 = vmatprep.subr.bf16.mxu1 %v2350_v5  ;;  %v2402_v5 = vld [vmem:[#allocation4 + $0x328] ss:$16 sps:$4 sm:$0xff]  }
 0x139   :  { %v499_v13 = vpop.f32.mrb[0].mxu0 }
 0x13a   :  { %v500_v14 = vadd.f32 %v499_v13, %v128_v11  ;;  %v501_v15 = vpop.f32.mrb[1].mxu0  ;;  %v2410_v11 = vld [vmem:[#allocation4 + $0x34c] ss:$16 sps:$4 sm:$0xff]   ;;  %v2408_v13 = vld [vmem:[#allocation4 + $0x348] ss:$16 sps:$4 sm:$0xff]  }
 0x13b   :  { %v502_v16 = vadd.f32 %v501_v15, %v132_v12  ;;  %v503_v17 = vpop.f32.mrb[2].mxu0  ;;  %v2614_v41 = vpop.f32.mrb[0].mxu1  ;;  %v2405_v12 = vld [vmem:[#allocation4 + $0x340] ss:$16 sps:$4 sm:$0xff]   ;;  %v2416_v15 = vld [vmem:[#allocation4 + $0x36c] ss:$16 sps:$4 sm:$0xff]  }
 0x13c   :  { %v547_v18 = vmax.f32 %v500_v14, 0.0  ;;  %v504_v19 = vpop.f32.mrb[3].mxu0  ;;  %v542_v44 = vpop.f32.mrb[1].mxu1  ;;  %v2413_v14 = vld [vmem:[#allocation4 + $0x364] ss:$16 sps:$4 sm:$0xff]  }
 0x13d   :  { %v548_v20 = vmax.f32 %v502_v16, 0.0  ;;  %v543_v47 = vadd.f32 %v542_v44, %v140_v40  ;;  %v544_v48 = vpop.f32.mrb[2].mxu1  ;;  %v2411_v16 = vld [vmem:[#allocation4 + $0x360] ss:$16 sps:$4 sm:$0xff]   ;;  %v2414_v17 = vld [vmem:[#allocation4 + $0x368] ss:$16 sps:$4 sm:$0xff]  }
 0x13e   :  { %v551_v24 = vpack.c.bf16 %v547_v18, %v547_v18  ;;  %v545_v49 = vpop.f32.mrb[3].mxu1  ;;  %v2419_v18 = vld [vmem:[#allocation4 + $0x384] ss:$16 sps:$4 sm:$0xff]   ;;  %v2422_v19 = vld [vmem:[#allocation4 + $0x38c] ss:$16 sps:$4 sm:$0xff]  }
 0x13f   :  { %v552_v21 = vpack.c.bf16 %v548_v20, %v548_v20  ;;  %v550_v50 = vmax.f32 %v543_v47, 0.0  ;;  %v2417_v20 = vld [vmem:[#allocation4 + $0x380] ss:$16 sps:$4 sm:$0xff]   ;;  %v2446_v44 = vld [vmem:[%s2739_s5 + $0xc8] sm:$0xff]  }
 0x140   :  { %v2443_v40 = vld [vmem:[%s2739_s5] sm:$0xff]   ;;  %v2449_v47 = vld [vmem:[%s2739_s5 + $0x50] sm:$0xff]  }
 0x141   :  { %1377 = vmatprep.mubr.bf16.mxu0 %v552_v21  ;;  %1459 = vmatprep.mubr.bf16.mxu1 %v552_v21  ;;  %v554_v55 = vpack.c.bf16 %v550_v50, %v550_v50  ;;  %v2420_v21 = vld [vmem:[#allocation4 + $0x388] ss:$16 sps:$4 sm:$0xff]   ;;  %v2450_v48 = vld [vmem:[%s2739_s5 + $0xd0] sm:$0xff]  }
 0x142   :  { %1378 = vmatmul.mubr.bf16.vlgmr.msra.gmra.mrb[4].mxu0 %v551_v24  ;;  %1460 = vmatmul.mubr.bf16.vlgmr.msra.gmra.mrb[4].mxu1 %v551_v24  ;;  %v2428_v24 = vld [vmem:[#allocation4 + $0x3ac] ss:$16 sps:$4 sm:$0xff]   ;;  %v2451_v49 = vld [vmem:[%s2739_s5 + $0x10] sm:$0xff]  }
 0x143   :  { %1387 = vmatpush1.bf16.msra.mxu0 %v2345_v22  ;;  %1469 = vmatpush1.bf16.msra.mxu1 %v2348_v23  ;;  %v135_v22 = vsub.s32 2, %v2595_v7  ;;  %v2425_v23 = vld [vmem:[#allocation4 + $0x3a4] ss:$16 sps:$4 sm:$0xff]  }
 0x144   :  { %1388 = vmatprep.subr.bf16.mxu0 %v2353_v25  ;;  %1470 = vmatprep.subr.bf16.mxu1 %v2356_v26  ;;  %v2423_v25 = vld [vmem:[#allocation4 + $0x3a0] ss:$16 sps:$4 sm:$0xff]   ;;  %v2426_v26 = vld [vmem:[#allocation4 + $0x3a8] ss:$16 sps:$4 sm:$0xff]  }
 0x145   :  { %1418 = vmatprep.mubr.bf16.mxu0 %v554_v55  ;;  %1500 = vmatprep.mubr.bf16.mxu1 %v554_v55  ;;  %v2452_v50 = vld [vmem:[%s2739_s5 + $0x90] sm:$0xff]   ;;  %v2457_v55 = vld [vmem:[%s2739_s5 + $0x60] sm:$0xff]  }
 0x147   :  { %1389 = vmatpush1.bf16.msra.mxu0 %v2351_v27  ;;  %1471 = vmatpush1.bf16.msra.mxu1 %v2354_v28  ;;  %v136_v27 = vrot.slane %v2601_v9, %v135_v22  ;;  %v2431_v28 = vld [vmem:[#allocation4 + $0x3c4] ss:$16 sps:$4 sm:$0xff]  }
 0x148   :  { %1390 = vmatprep.subr.bf16.mxu0 %v2359_v29  ;;  %1472 = vmatprep.subr.bf16.mxu1 %v2362_v30  ;;  %v2434_v29 = vld [vmem:[#allocation4 + $0x3cc] ss:$16 sps:$4 sm:$0xff]   ;;  %v2429_v30 = vld [vmem:[#allocation4 + $0x3c0] ss:$16 sps:$4 sm:$0xff]  }
 0x149   :  { %v2441_v9 = vld [vmem:[%s2739_s5 + $0x40] sm:$0xff]  }
 0x14b   :  { %1391 = vmatpush1.bf16.msra.mxu0 %v2357_v31  ;;  %1473 = vmatpush1.bf16.msra.mxu1 %v2360_v32  ;;  %v2432_v31 = vld [vmem:[#allocation4 + $0x3c8] ss:$16 sps:$4 sm:$0xff]   ;;  %v541_v32 = vadd.f32 %v2614_v41, %v136_v27  ;;  %v2444_v41 = vld [vmem:[%s2739_s5 + $0x80] sm:$0xff]  }
 0x14c   :  { %1392 = vmatprep.subr.bf16.mxu0 %v2365_v33  ;;  %1474 = vmatprep.subr.bf16.mxu1 %v2368_v34  ;;  %v2437_v33 = vld [vmem:[#allocation4 + $0x3e4] ss:$16 sps:$4 sm:$0xff]   ;;  %v2440_v34 = vld [vmem:[#allocation4 + $0x3ec] ss:$16 sps:$4 sm:$0xff]  }
 0x14f   :  { %1393 = vmatpush1.bf16.msra.mxu0 %v2363_v36  ;;  %1475 = vmatpush1.bf16.msra.mxu1 %v2366_v37  ;;  %v2435_v36 = vld [vmem:[#allocation4 + $0x3e0] ss:$16 sps:$4 sm:$0xff]   ;;  %v2438_v37 = vld [vmem:[#allocation4 + $0x3e8] ss:$16 sps:$4 sm:$0xff]  }
 0x150   :  { %1394 = vmatprep.subr.bf16.mxu0 %v2371_v38  ;;  %1476 = vmatprep.subr.bf16.mxu1 %v2374_v39  ;;  %v549_v38 = vmax.f32 %v541_v32, 0.0  ;;  %v2442_v39 = vld [vmem:[%s2739_s5 + $0xc0] sm:$0xff]  }
 0x153   :  { %1395 = vmatpush1.bf16.msra.mxu0 %v2369_v42  ;;  %1477 = vmatpush1.bf16.msra.mxu1 %v2372_v43  ;;  %v553_v42 = vpack.c.bf16 %v549_v38, %v549_v38  ;;  %v2445_v43 = vld [vmem:[%s2739_s5 + $0x48] sm:$0xff]  }
 0x154   :  { %1396 = vmatprep.subr.bf16.mxu0 %v2377_v45  ;;  %1478 = vmatprep.subr.bf16.mxu1 %v2380_v46  ;;  %v2447_v45 = vld [vmem:[%s2739_s5 + $0x8] sm:$0xff]  }
 0x155   :  { %v2448_v46 = vld [vmem:[%s2739_s5 + $0x88] sm:$0xff]  }
 0x157   :  { %1397 = vmatpush1.bf16.msra.mxu0 %v2375_v51  ;;  %1479 = vmatpush1.bf16.msra.mxu1 %v2378_v52  ;;  %v2453_v51 = vld [vmem:[%s2739_s5 + $0x58] sm:$0xff]  }
 0x158   :  { %1398 = vmatprep.subr.bf16.mxu0 %v2383_v53  ;;  %1480 = vmatprep.subr.bf16.mxu1 %v2386_v54  ;;  %v2454_v52 = vld [vmem:[%s2739_s5 + $0xd8] sm:$0xff]  }
 0x159   :  { %v2455_v53 = vld [vmem:[%s2739_s5 + $0x18] sm:$0xff]  }
 0x15a   :  { %v2456_v54 = vld [vmem:[%s2739_s5 + $0x98] sm:$0xff]  }
 0x15b   :  { %1399 = vmatpush1.bf16.msra.mxu0 %v2381_v56  ;;  %1481 = vmatpush1.bf16.msra.mxu1 %v2384_v57  ;;  %v2458_v56 = vld [vmem:[%s2739_s5 + $0xe0] sm:$0xff]  }
 0x15c   :  { %1400 = vmatprep.subr.bf16.mxu0 %v2389_v58  ;;  %1482 = vmatprep.subr.bf16.mxu1 %v2392_v59  ;;  %v2459_v57 = vld [vmem:[%s2739_s5 + $0x20] sm:$0xff]   ;;  %v2461_v59 = vld [vmem:[%s2739_s5 + $0x68] sm:$0xff]  }
 0x15d   :  { %v2460_v58 = vld [vmem:[%s2739_s5 + $0xa0] sm:$0xff]  }
 0x15f   :  { %1401 = vmatpush1.bf16.msra.mxu0 %v2387_v60  ;;  %1483 = vmatpush1.bf16.msra.mxu1 %v2390_v61  ;;  %v2462_v60 = vld [vmem:[%s2739_s5 + $0xe8] sm:$0xff]  }
 0x160   :  { %1402 = vmatprep.subr.bf16.mxu0 %v2395_v62  ;;  %1484 = vmatprep.subr.bf16.mxu1 %v2398_v63  ;;  %v2463_v61 = vld [vmem:[%s2739_s5 + $0x28] sm:$0xff]   ;;  %v2465_v63 = vld [vmem:[%s2739_s5 + $0x70] sm:$0xff]  }
 0x161   :  { %v2464_v62 = vld [vmem:[%s2739_s5 + $0xa8] sm:$0xff]  }
 0x163   :  { %1403 = vmatpush1.bf16.msra.mxu0 %v2393_v0  ;;  %1485 = vmatpush1.bf16.msra.mxu1 %v2396_v1  ;;  %v2466_v0 = vld [vmem:[%s2739_s5 + $0xf0] sm:$0xff]  }
 0x164   :  { %1404 = vmatprep.subr.bf16.mxu0 %v2401_v2  ;;  %1486 = vmatprep.subr.bf16.mxu1 %v2404_v3  ;;  %v2467_v1 = vld [vmem:[%s2739_s5 + $0x30] sm:$0xff]   ;;  %v2469_v3 = vld [vmem:[%s2739_s5 + $0x78] sm:$0xff]  }
 0x165   :  { %v2468_v2 = vld [vmem:[%s2739_s5 + $0xb0] sm:$0xff]  }
 0x167   :  { %1405 = vmatpush1.bf16.msra.mxu0 %v2399_v4  ;;  %1487 = vmatpush1.bf16.msra.mxu1 %v2402_v5  ;;  %v2470_v4 = vld [vmem:[%s2739_s5 + $0xf8] sm:$0xff]  }
 0x168   :  { %1406 = vmatprep.subr.bf16.mxu0 %v2407_v6  ;;  %1488 = vmatprep.subr.bf16.mxu1 %v2410_v11  ;;  %v2471_v5 = vld [vmem:[%s2739_s5 + $0x38] sm:$0xff]   ;;  %v683_v11 = vld [vmem:[%s2738_s4] sm:$0xf] }
 0x169   :  { %v2472_v6 = vld [vmem:[%s2739_s5 + $0xb8] sm:$0xff]  }
 0x16b   :  { %1407 = vmatpush1.bf16.msra.mxu0 %v2405_v12  ;;  %1489 = vmatpush1.bf16.msra.mxu1 %v2408_v13  ;;  %v688_v12 = vrot.slane %v683_v11, %v127_v8  ;;  %v696_v13 = vrot.slane %v683_v11, %v135_v22 }
 0x16c   :  { %1408 = vmatprep.subr.bf16.mxu0 %v2413_v14  ;;  %1490 = vmatprep.subr.bf16.mxu1 %v2416_v15  ;;  %v692_v14 = vrot.slane %v683_v11, %v131_v10  ;;  %v700_v15 = vrot.slane %v683_v11, %v139_v35 }
 0x16f   :  { %1409 = vmatpush1.bf16.msra.mxu0 %v2411_v16  ;;  %1491 = vmatpush1.bf16.msra.mxu1 %v2414_v17 }
 0x170   :  { %1410 = vmatprep.subr.bf16.mxu0 %v2419_v18  ;;  %1492 = vmatprep.subr.bf16.mxu1 %v2422_v19 }
 0x173   :  { %1411 = vmatpush1.bf16.msra.mxu0 %v2417_v20  ;;  %1493 = vmatpush1.bf16.msra.mxu1 %v2420_v21 }
 0x174   :  { %1412 = vmatprep.subr.bf16.mxu0 %v2425_v23  ;;  %1494 = vmatprep.subr.bf16.mxu1 %v2428_v24 }
 0x177   :  { %1413 = vmatpush1.bf16.msra.mxu0 %v2423_v25  ;;  %1495 = vmatpush1.bf16.msra.mxu1 %v2426_v26 }
 0x178   :  { %1414 = vmatprep.subr.bf16.mxu0 %v2431_v28  ;;  %1496 = vmatprep.subr.bf16.mxu1 %v2434_v29 }
 0x17b   :  { %1415 = vmatpush1.bf16.msra.mxu0 %v2429_v30  ;;  %1497 = vmatpush1.bf16.msra.mxu1 %v2432_v31 }
 0x17c   :  { %1416 = vmatprep.subr.bf16.mxu0 %v2437_v33  ;;  %1498 = vmatprep.subr.bf16.mxu1 %v2440_v34  ;;  %v2060_v34 = vld [vmem:[%s2740_s6] ss:$0 sm:$0xff] }
 0x17f   :  { %1417 = vmatpush1.bf16.msra.mxu0 %v2435_v36  ;;  %1499 = vmatpush1.bf16.msra.mxu1 %v2438_v37 }
 0x180   :  { %2093 = vmatprep.subr.bf16.mxu0 %v2441_v9  ;;  %2115 = vmatprep.subr.bf16.mxu1 %v2442_v39 }
 0x182   :  { %1419 = vmatmul.mubr.bf16.vlgmr.msra.gmra.mrb[4].mxu0 %v553_v42  ;;  %1501 = vmatmul.mubr.bf16.vlgmr.msra.gmra.mrb[4].mxu1 %v553_v42 }
 0x183   :  { %2094 = vmatpush3.bf16.msra.mxu0 %v2443_v40  ;;  %2116 = vmatpush3.bf16.msra.mxu1 %v2444_v41 }
 0x184   :  { %2095 = vmatprep.subr.bf16.mxu0 %v2445_v43  ;;  %2117 = vmatprep.subr.bf16.mxu1 %v2446_v44 }
 0x187   :  { %2096 = vmatpush3.bf16.msra.mxu0 %v2447_v45  ;;  %2118 = vmatpush3.bf16.msra.mxu1 %v2448_v46 }
 0x188   :  { %2097 = vmatprep.subr.bf16.mxu0 %v2449_v47  ;;  %2119 = vmatprep.subr.bf16.mxu1 %v2450_v48 }
 0x18b   :  { %2098 = vmatpush3.bf16.msra.mxu0 %v2451_v49  ;;  %2120 = vmatpush3.bf16.msra.mxu1 %v2452_v50 }
 0x18c   :  { %2099 = vmatprep.subr.bf16.mxu0 %v2453_v51  ;;  %2121 = vmatprep.subr.bf16.mxu1 %v2454_v52 }
 0x18f   :  { %2100 = vmatpush3.bf16.msra.mxu0 %v2455_v53  ;;  %2122 = vmatpush3.bf16.msra.mxu1 %v2456_v54 }
 0x190   :  { %2101 = vmatprep.subr.bf16.mxu0 %v2457_v55  ;;  %2123 = vmatprep.subr.bf16.mxu1 %v2458_v56 }
 0x193   :  { %2102 = vmatpush3.bf16.msra.mxu0 %v2459_v57  ;;  %2124 = vmatpush3.bf16.msra.mxu1 %v2460_v58 }
 0x194   :  { %2103 = vmatprep.subr.bf16.mxu0 %v2461_v59  ;;  %2125 = vmatprep.subr.bf16.mxu1 %v2462_v60 }
 0x197   :  { %2104 = vmatpush3.bf16.msra.mxu0 %v2463_v61  ;;  %2126 = vmatpush3.bf16.msra.mxu1 %v2464_v62 }
 0x198   :  { %2105 = vmatprep.subr.bf16.mxu0 %v2465_v63  ;;  %2127 = vmatprep.subr.bf16.mxu1 %v2466_v0 }
 0x19b   :  { %2106 = vmatpush3.bf16.msra.mxu0 %v2467_v1  ;;  %2128 = vmatpush3.bf16.msra.mxu1 %v2468_v2 }
 0x19c   :  { %2107 = vmatprep.subr.bf16.mxu0 %v2469_v3  ;;  %2129 = vmatprep.subr.bf16.mxu1 %v2470_v4 }
 0x19f   :  { %2108 = vmatpush3.bf16.msra.mxu0 %v2471_v5  ;;  %2130 = vmatpush3.bf16.msra.mxu1 %v2472_v6 }
 0x255   :  { %v1420_v16 = vpop.f32.mrb[4].mxu0  ;;  %v1502_v17 = vpop.f32.mrb[4].mxu1 }
 0x256   :  { %v2137_v18 = vadd.f32 %v1420_v16, %v688_v12  ;;  %v2139_v19 = vadd.f32 %v1502_v17, %v696_v13  ;;  %v1422_v20 = vpop.f32.mrb[5].mxu0  ;;  %v1504_v21 = vpop.f32.mrb[5].mxu1 }
 0x257   :  { %v2138_v23 = vadd.f32 %v1422_v20, %v692_v14  ;;  %v2140_v24 = vadd.f32 %v1504_v21, %v700_v15  ;;  %v1424_v25 = vpop.f32.mrb[6].mxu0  ;;  %v1506_v26 = vpop.f32.mrb[6].mxu1 }
 0x258   :  { %v1509_v8 = vmax.f32 %v2137_v18, 0.0  ;;  %v1511_v27 = vmax.f32 %v2139_v19, 0.0  ;;  %v1425_v28 = vpop.f32.mrb[7].mxu0  ;;  %v1507_v22 = vpop.f32.mrb[7].mxu1 }
 0x259   :  { %v1510_v29 = vmax.f32 %v2138_v23, 0.0  ;;  %v1512_v30 = vmax.f32 %v2140_v24, 0.0 }
 0x25a   :  { %v1513_v7 = vpack.c.bf16 %v1509_v8, %v1509_v8  ;;  %v1515_v35 = vpack.c.bf16 %v1511_v27, %v1511_v27 }
 0x25b   :  { %v1514_v10 = vpack.c.bf16 %v1510_v29, %v1510_v29  ;;  %v1516_v31 = vpack.c.bf16 %v1512_v30, %v1512_v30 }
 0x25d   :  { %1812 = vmatprep.mubr.bf16.mxu0 %v1514_v10  ;;  %1852 = vmatprep.mubr.bf16.mxu1 %v1516_v31 }
 0x25e   :  { %1813 = vmatmul.mubr.bf16.vlgmr.msra.gmra.mrb[8].mxu0 %v1513_v7  ;;  %1853 = vmatmul.mubr.bf16.vlgmr.msra.gmra.mrb[8].mxu1 %v1515_v35 }
 0x331   :  { %v2109_v32 = vpop.f32.mrb[8].mxu0  ;;  %v2131_v33 = vpop.f32.mrb[8].mxu1 }
 0x332   :  { %v2110_v36 = vpop.f32.mrb[9].mxu0  ;;  %v2132_v37 = vpop.f32.mrb[9].mxu1 }
 0x333   :  { %v2111_v38 = vadd.f32 %v2110_v36, %v2109_v32  ;;  %v2133_v9 = vadd.f32 %v2132_v37, %v2131_v33  ;;  %v2112_v39 = vpop.f32.mrb[10].mxu0  ;;  %v2134_v40 = vpop.f32.mrb[10].mxu1 }
 0x334   :  { %v2113_v41 = vpop.f32.mrb[11].mxu0  ;;  %v2135_v42 = vpop.f32.mrb[11].mxu1 }
 0x335   :  { %v1815_v43 = vadd.f32 %v2111_v38, %v2060_v34 }
 0x337   :  { %v1855_v44 = vadd.f32 %v2133_v9, %v1815_v43 }
 0x339   :  { %v1860_v45 = vpack.c.bf16 %v1855_v44, %v1855_v44 }
 0x33b   :  { %1861 = vst [vmem:[%s2741_s7] sm:$0xf] %v1860_v45 }
 0x33c   :  { %1866 = vsyncpa [#allocation3], 1 }
 0x33d   :  { %1867 = vsyncpa [#allocation5], 1 }

</bundles_post_ra>
